<compile_context>
chip_gen: v6e
topology: v6e:2x2x1
jax: 0.10.0
libtpu: 0.0.40
codegen_flags: <defaults>
</compile_context>

<pallas_src>
import math

import jax
import jax.numpy as jnp
from jax.experimental import pallas as pl
from jax.experimental.pallas import tpu as pltpu


def _round_up(x, m):
    return ((x + m - 1) // m) * m


def _pick_batch_tile(B):
    # Small / typical replay batches: a single tile (block == full batch is a
    # legal sublane extent) -> one grid step, minimal per-step overhead.
    if B <= 512:
        return B
    # Large batches: tiles up to 2048 rows and >= 2 grid steps so v7x's two
    # TensorCores both get work; multiple of 256 keeps sublanes aligned and the
    # ragged tail legal.
    return min(2048, _round_up(pl.cdiv(B, 2), 256))


def dqn_kernel(x_ref, w1_ref, b1_ref, w2_ref, b2_ref, w3_ref, b3_ref,
               q_ref, act_ref):
    # Matmul operands in bf16 (MXU-native on v6e/v7x), f32 accumulation,
    # all elementwise work in f32.
    x = x_ref[...].astype(jnp.bfloat16)

    h1 = jnp.dot(x, w1_ref[...], preferred_element_type=jnp.float32)
    h1 = jnp.maximum(h1 + b1_ref[...], 0.0)

    h2 = jnp.dot(h1.astype(jnp.bfloat16), w2_ref[...],
                 preferred_element_type=jnp.float32)
    h2 = jnp.maximum(h2 + b2_ref[...], 0.0)

    q = jnp.dot(h2.astype(jnp.bfloat16), w3_ref[...],
                preferred_element_type=jnp.float32) + b3_ref[...]
    q_ref[...] = q.astype(q_ref.dtype)

    # Fused greedy-action epilogue (first-occurrence argmax, matching jnp.argmax).
    col = jax.lax.broadcasted_iota(jnp.int32, q.shape, 1)
    qmax = jnp.max(q, axis=-1, keepdims=True)
    first_max = jnp.where(q == qmax, col, q.shape[-1])
    act_ref[...] = jnp.min(first_max, axis=-1, keepdims=True).astype(jnp.int32)


@jax.jit
def dqn_forward(x, kparams):
    """x: (B, n_observations) f32. kparams: bf16 weights, f32 biases, (in, out) layout.
    Returns (q_values (B, n_actions) f32, greedy_actions (B,) int32)."""
    w1, b1, w2, b2, w3, b3 = (kparams[k] for k in ("w1", "b1", "w2", "b2", "w3", "b3"))

    B, K = x.shape
    H = w1.shape[1]                 # hidden width (128)
    A = w3.shape[1]                 # n_actions

    TB = _pick_batch_tile(B)
    grid = (pl.cdiv(B, TB),)

    q, act = pl.pallas_call(
        dqn_kernel,
        out_shape=(
            jax.ShapeDtypeStruct((B, A), jnp.float32),
            jax.ShapeDtypeStruct((B, 1), jnp.int32),
        ),
        grid=grid,
        in_specs=[
            pl.BlockSpec((TB, K), lambda i: (i, 0)),   # x: tiled over batch, unpadded K
            pl.BlockSpec((K, H), lambda i: (0, 0)),    # w1: VMEM-resident
            pl.BlockSpec((1, H), lambda i: (0, 0)),    # b1
            pl.BlockSpec((H, H), lambda i: (0, 0)),    # w2
            pl.BlockSpec((1, H), lambda i: (0, 0)),    # b2
            pl.BlockSpec((H, A), lambda i: (0, 0)),    # w3 (unpadded A)
            pl.BlockSpec((1, A), lambda i: (0, 0)),    # b3
        ],
        out_specs=(
            pl.BlockSpec((TB, A), lambda i: (i, 0)),   # Q-values (B, A), no lane padding
            pl.BlockSpec((TB, 1), lambda i: (i, 0)),   # greedy actions
        ),
        compiler_params=pltpu.CompilerParams(
            dimension_semantics=("parallel",),
        ),
    )(x, w1, b1, w2, b2, w3, b3)

    return q, act[:, 0]


def init_dqn_params(key, n_observations, n_actions, hidden=128):
    """f32 master params mimicking PyTorch nn.Linear default init
    (uniform +/- 1/sqrt(fan_in)); weights stored (in, out)."""
    keys = jax.random.split(key, 6)

    def linear(kw, kb, fan_in, fan_out):
        bound = 1.0 / math.sqrt(fan_in)
        w = jax.random.uniform(kw, (fan_in, fan_out), jnp.float32, -bound, bound)
        b = jax.random.uniform(kb, (1, fan_out), jnp.float32, -bound, bound)
        return w, b

    w1, b1 = linear(keys[0], keys[1], n_observations, hidden)
    w2, b2 = linear(keys[2], keys[3], hidden, hidden)
    w3, b3 = linear(keys[4], keys[5], hidden, n_actions)
    return {"w1": w1, "b1": b1, "w2": w2, "b2": b2, "w3": w3, "b3": b3}


def to_kernel_params(params):
    """One-time cast: bf16 matmul weights (MXU density, half VMEM/DMA), f32 biases."""
    out = {}
    for k, v in params.items():
        out[k] = v.astype(jnp.bfloat16) if k.startswith("w") else v
    return out


def dqn_reference(x, params):
    """Pure-f32 reference matching the PyTorch module."""
    h1 = jnp.maximum(x @ params["w1"] + params["b1"], 0.0)
    h2 = jnp.maximum(h1 @ params["w2"] + params["b2"], 0.0)
    return h2 @ params["w3"] + params["b3"]


if __name__ == "__main__":
    key = jax.random.PRNGKey(0)
    k_params, k_x = jax.random.split(key)

    batch = 8
    n_observations = 16
    n_actions = 4

    params = init_dqn_params(k_params, n_observations, n_actions)
    kparams = to_kernel_params(params)
    x = jax.random.normal(k_x, (batch, n_observations), dtype=jnp.float32)

    q, actions = dqn_forward(x, kparams)
    q = jax.block_until_ready(q)
    actions = jax.block_until_ready(actions)

    ref_q = dqn_reference(x, params)

    assert q.shape == (batch, n_actions), q.shape
    assert actions.shape == (batch,), actions.shape
    # bf16 matmul operands vs f32 reference: loose tolerance.
    assert jnp.allclose(q, ref_q, atol=2e-2, rtol=2e-2), "Q-value mismatch vs f32 reference"
    # Fused argmax must match argmax of the kernel's own Q output exactly.
    assert jnp.array_equal(actions, jnp.argmax(q, axis=-1).astype(jnp.int32)), \
        "greedy-action mismatch vs argmax(Q)"

    print("KERNEL_OK")
</pallas_src>

<mosaic_0001>
module attributes {stable_mosaic.version = 11 : i64} {
  func.func @dqn_kernel(%arg0: i32, %arg1: memref<8x16xf32, #tpu.memory_space<vmem>>, %arg2: memref<16x128xbf16, #tpu.memory_space<vmem>>, %arg3: memref<1x128xf32, #tpu.memory_space<vmem>>, %arg4: memref<128x128xbf16, #tpu.memory_space<vmem>>, %arg5: memref<1x128xf32, #tpu.memory_space<vmem>>, %arg6: memref<128x4xbf16, #tpu.memory_space<vmem>>, %arg7: memref<1x4xf32, #tpu.memory_space<vmem>>, %arg8: memref<8x4xf32, #tpu.memory_space<vmem>>, %arg9: memref<8x1xi32, #tpu.memory_space<vmem>>) attributes {dimension_semantics = [#tpu.dimension_semantics<parallel>], iteration_bounds = array<i64: 1>, scalar_prefetch = 0 : i64, scratch_operands = 0 : i64, tpu.core_type = #tpu.core_type<tc>, window_params = [{transform_indices = @transform_0, window_bounds = array<i64: 8, 16>}, {pipeline_mode = #tpu.pipeline_mode<synchronous>, transform_indices = @transform_1, window_bounds = array<i64: 16, 128>}, {pipeline_mode = #tpu.pipeline_mode<synchronous>, transform_indices = @transform_2, window_bounds = array<i64: 1, 128>}, {pipeline_mode = #tpu.pipeline_mode<synchronous>, transform_indices = @transform_3, window_bounds = array<i64: 128, 128>}, {pipeline_mode = #tpu.pipeline_mode<synchronous>, transform_indices = @transform_4, window_bounds = array<i64: 1, 128>}, {pipeline_mode = #tpu.pipeline_mode<synchronous>, transform_indices = @transform_5, window_bounds = array<i64: 128, 4>}, {pipeline_mode = #tpu.pipeline_mode<synchronous>, transform_indices = @transform_6, window_bounds = array<i64: 1, 4>}, {transform_indices = @transform_7, window_bounds = array<i64: 8, 4>}, {transform_indices = @transform_8, window_bounds = array<i64: 8, 1>}]} {
    %c0 = arith.constant 0 : index
    %c0_0 = arith.constant 0 : index
    %0 = vector.load %arg1[%c0, %c0_0] : memref<8x16xf32, #tpu.memory_space<vmem>>, vector<8x16xf32>
    %1 = arith.truncf %0 : vector<8x16xf32> to vector<8x16xbf16>
    %c0_1 = arith.constant 0 : index
    %c0_2 = arith.constant 0 : index
    %2 = vector.load %arg2[%c0_1, %c0_2] : memref<16x128xbf16, #tpu.memory_space<vmem>>, vector<16x128xbf16>
    %cst = arith.constant dense<0.000000e+00> : vector<8x128xf32>
    %3 = tpu.matmul %1, %2, %cst {dimension_numbers = #tpu.dot_dimension_numbers<[1], [0], [0], [1], [0, 0, 1, 1], [], []>} : vector<8x16xbf16>, vector<16x128xbf16>, vector<8x128xf32> -> vector<8x128xf32>
    %c0_3 = arith.constant 0 : index
    %c0_4 = arith.constant 0 : index
    %4 = vector.load %arg3[%c0_3, %c0_4] : memref<1x128xf32, #tpu.memory_space<vmem>>, vector<1x128xf32>
    %5 = vector.broadcast %4 : vector<1x128xf32> to vector<8x128xf32>
    %6 = arith.addf %3, %5 : vector<8x128xf32>
    %cst_5 = arith.constant 0.000000e+00 : f32
    %7 = vector.broadcast %cst_5 : f32 to vector<8x128xf32>
    %8 = arith.maximumf %6, %7 : vector<8x128xf32>
    %9 = arith.truncf %8 : vector<8x128xf32> to vector<8x128xbf16>
    %c0_6 = arith.constant 0 : index
    %c0_7 = arith.constant 0 : index
    %10 = vector.load %arg4[%c0_6, %c0_7] : memref<128x128xbf16, #tpu.memory_space<vmem>>, vector<128x128xbf16>
    %cst_8 = arith.constant dense<0.000000e+00> : vector<8x128xf32>
    %11 = tpu.matmul %9, %10, %cst_8 {dimension_numbers = #tpu.dot_dimension_numbers<[1], [0], [0], [1], [0, 0, 1, 1], [], []>} : vector<8x128xbf16>, vector<128x128xbf16>, vector<8x128xf32> -> vector<8x128xf32>
    %c0_9 = arith.constant 0 : index
    %c0_10 = arith.constant 0 : index
    %12 = vector.load %arg5[%c0_9, %c0_10] : memref<1x128xf32, #tpu.memory_space<vmem>>, vector<1x128xf32>
    %13 = vector.broadcast %12 : vector<1x128xf32> to vector<8x128xf32>
    %14 = arith.addf %11, %13 : vector<8x128xf32>
    %cst_11 = arith.constant 0.000000e+00 : f32
    %15 = vector.broadcast %cst_11 : f32 to vector<8x128xf32>
    %16 = arith.maximumf %14, %15 : vector<8x128xf32>
    %17 = arith.truncf %16 : vector<8x128xf32> to vector<8x128xbf16>
    %c0_12 = arith.constant 0 : index
    %c0_13 = arith.constant 0 : index
    %18 = vector.load %arg6[%c0_12, %c0_13] : memref<128x4xbf16, #tpu.memory_space<vmem>>, vector<128x4xbf16>
    %cst_14 = arith.constant dense<0.000000e+00> : vector<8x4xf32>
    %19 = tpu.matmul %17, %18, %cst_14 {dimension_numbers = #tpu.dot_dimension_numbers<[1], [0], [0], [1], [0, 0, 1, 1], [], []>} : vector<8x128xbf16>, vector<128x4xbf16>, vector<8x4xf32> -> vector<8x4xf32>
    %c0_15 = arith.constant 0 : index
    %c0_16 = arith.constant 0 : index
    %20 = vector.load %arg7[%c0_15, %c0_16] : memref<1x4xf32, #tpu.memory_space<vmem>>, vector<1x4xf32>
    %21 = vector.broadcast %20 : vector<1x4xf32> to vector<8x4xf32>
    %22 = arith.addf %19, %21 : vector<8x4xf32>
    %c0_17 = arith.constant 0 : index
    %c0_18 = arith.constant 0 : index
    %23 = vector.load %arg8[%c0_17, %c0_18] : memref<8x4xf32, #tpu.memory_space<vmem>>, vector<8x4xf32>
    tpu.vector_store %arg8[%c0_17, %c0_18], %22 {strides = array<i32>} : memref<8x4xf32, #tpu.memory_space<vmem>>, vector<8x4xf32>,
    %24 = tpu.iota {dimensions = array<i32: 1>} : vector<8x4xi32>
    %cst_19 = arith.constant dense<0xFF800000> : vector<8xf32>
    %25 = vector.multi_reduction <maximumf>, %22, %cst_19 [1] : vector<8x4xf32> to vector<8xf32>
    %26 = vector.shape_cast %25 : vector<8xf32> to vector<8x1xf32>
    %27 = vector.broadcast %26 : vector<8x1xf32> to vector<8x4xf32>
    %28 = arith.cmpf oeq, %22, %27 : vector<8x4xf32>
    %c4_i32 = arith.constant 4 : i32
    %29 = vector.broadcast %c4_i32 : i32 to vector<8x4xi32>
    %30 = arith.select %28, %24, %29 : vector<8x4xi1>, vector<8x4xi32>
    %cst_20 = arith.constant dense<2147483647> : vector<8xi32>
    %31 = vector.multi_reduction <minsi>, %30, %cst_20 [1] : vector<8x4xi32> to vector<8xi32>
    %32 = vector.shape_cast %31 : vector<8xi32> to vector<8x1xi32>
    %c0_21 = arith.constant 0 : index
    %c0_22 = arith.constant 0 : index
    %33 = vector.load %arg9[%c0_21, %c0_22] : memref<8x1xi32, #tpu.memory_space<vmem>>, vector<8x1xi32>
    tpu.vector_store %arg9[%c0_21, %c0_22], %32 {strides = array<i32>} : memref<8x1xi32, #tpu.memory_space<vmem>>, vector<8x1xi32>,
    return
  }
  func.func @transform_0(%arg0: i32) -> (i32, i32) {
    %c0_i32 = arith.constant 0 : i32
    %c0_i32_0 = arith.constant 0 : i32
    return %arg0, %c0_i32 : i32, i32
  }
  func.func @transform_1(%arg0: i32) -> (i32, i32) {
    %c0_i32 = arith.constant 0 : i32
    %c0_i32_0 = arith.constant 0 : i32
    %c0_i32_1 = arith.constant 0 : i32
    return %c0_i32, %c0_i32_0 : i32, i32
  }
  func.func @transform_2(%arg0: i32) -> (i32, i32) {
    %c0_i32 = arith.constant 0 : i32
    %c0_i32_0 = arith.constant 0 : i32
    %c0_i32_1 = arith.constant 0 : i32
    return %c0_i32, %c0_i32_0 : i32, i32
  }
  func.func @transform_3(%arg0: i32) -> (i32, i32) {
    %c0_i32 = arith.constant 0 : i32
    %c0_i32_0 = arith.constant 0 : i32
    %c0_i32_1 = arith.constant 0 : i32
    return %c0_i32, %c0_i32_0 : i32, i32
  }
  func.func @transform_4(%arg0: i32) -> (i32, i32) {
    %c0_i32 = arith.constant 0 : i32
    %c0_i32_0 = arith.constant 0 : i32
    %c0_i32_1 = arith.constant 0 : i32
    return %c0_i32, %c0_i32_0 : i32, i32
  }
  func.func @transform_5(%arg0: i32) -> (i32, i32) {
    %c0_i32 = arith.constant 0 : i32
    %c0_i32_0 = arith.constant 0 : i32
    %c0_i32_1 = arith.constant 0 : i32
    return %c0_i32, %c0_i32_0 : i32, i32
  }
  func.func @transform_6(%arg0: i32) -> (i32, i32) {
    %c0_i32 = arith.constant 0 : i32
    %c0_i32_0 = arith.constant 0 : i32
    %c0_i32_1 = arith.constant 0 : i32
    return %c0_i32, %c0_i32_0 : i32, i32
  }
  func.func @transform_7(%arg0: i32) -> (i32, i32) {
    %c0_i32 = arith.constant 0 : i32
    %c0_i32_0 = arith.constant 0 : i32
    return %arg0, %c0_i32 : i32, i32
  }
  func.func @transform_8(%arg0: i32) -> (i32, i32) {
    %c0_i32 = arith.constant 0 : i32
    %c0_i32_0 = arith.constant 0 : i32
    return %arg0, %c0_i32 : i32, i32
  }
}

</mosaic_0001>

<bundles_post_ra>
// kernel: dqn_forward.1
= control target key start
LH: loop header
LB: loop body
LE: loop exit
PB: predicated region body
PF: predicated region fallthrough
CT: control target
= control target key end

     0   :  { %14 = vsyncpa [#allocation3], 0  ;;  %s672_s0 = inlined_call_operand.vmem [shape: f32[8,16], index: 0, kind: input, shape index: {}]   ;;  %s673_s1 = inlined_call_operand.hbm [shape: bf16[16,128], index: 1, kind: input, shape index: {}]   ;;  %s674_s2 = inlined_call_operand.vmem [shape: f32[1,128], index: 2, kind: input, shape index: {}]   ;;  %s675_s3 = inlined_call_operand.vmem [shape: bf16[128,128], index: 3, kind: input, shape index: {}]   ;;  %s676_s4 = inlined_call_operand.vmem [shape: f32[1,128], index: 4, kind: input, shape index: {}]   ;;  %s677_s5 = inlined_call_operand.vmem [shape: bf16[128,4], index: 5, kind: input, shape index: {}]   ;;  %s678_s6 = inlined_call_operand.hbm [shape: f32[1,4], index: 6, kind: input, shape index: {}]   ;;  %s679_s7 = inlined_call_operand.vmem [shape: f32[8,4], index: 7, kind: output, shape index: {0}]   ;;  %s680_s8 = inlined_call_operand.vmem [shape: s32[8,1], index: 8, kind: output, shape index: {1}]  }
   0x1   :  { %15 = vsyncpa [#allocation5], 0  ;;  %s532_s27 = smov [#allocation2]  }
   0x2   :  { %s23_s28 = sshll.u32 %s532_s27, 4  ;;  %s24_s28 = int_to_ptr.vmem [resolvable:$true] %s23_s28 }
   0x3   :  { %s496_s29 = scalar_lea.vmem %s24_s28, 128  ;;  %p501_p1 = scmp.lt.s32.totalorder %s24_s28, %s24_s28 }
   0x4   :  { %p497_p0 = scmp.ne.s32.totalorder %s24_s28, %s496_s29  ;;  %p502_p2 = scmp.lt.s32.totalorder %s496_s29, %s496_s29 }
   0x6   :  { %p503_p3 = por %p502_p2, %p501_p1 }
   0x8   :  { %p504_p4 = pnand %p503_p3, %p497_p0 }
   0xa   :  { %507 = shalt.err (!%p504_p4)
}
   0xb   :  { %s533_s30 = smov 64   ;;  %s534_s9 = smov 4  }
   0xc   :  { %29 = dma.hbm_to_vmem [thread:$0]  %s673_s1, 128, %s24_s28, [#allocation3], %s533_s30, %s533_s30, %s534_s9  }
   0xd   :  { %s535_s12 = smov [#allocation4]  }
   0xe   :  { %s44_s13 = sshll.u32 %s535_s12, 4  ;;  %s45_s13 = int_to_ptr.vmem [resolvable:$true] %s44_s13 }
   0xf   :  { %s516_s14 = scalar_lea.vmem %s45_s13, 16  ;;  %s520_s15 = scalar_lea.vmem %s45_s13, 32 }
  0x10   :  { %p517_p5 = scmp.ne.s32.totalorder %s45_s13, %s516_s14  ;;  %p521_p6 = scmp.lt.s32.totalorder %s45_s13, %s45_s13 }
  0x11   :  { %p522_p7 = scmp.lt.s32.totalorder %s520_s15, %s516_s14 }
  0x13   :  { %p523_p8 = por %p522_p7, %p521_p6 }
  0x15   :  { %p524_p9 = pnand %p523_p8, %p517_p5 }
  0x17   :  { %527 = shalt.err (!%p524_p9)
}
  0x18   :  { %47 = dma.hbm_to_vmem [thread:$0]  %s678_s6, 16, %s45_s13, [#allocation5]  }
  0x19   :  { %528 = dma.done.wait [#allocation3], 128  }
  0x1a   :  { %529 = vsyncadd [#allocation3], 4294967168 }
  0x1b   :  { %530 = dma.done.wait [#allocation5], 16  }
  0x1c   :  { %531 = vsyncadd [#allocation5], 4294967280  ;;  %v536_v0 = vmov 0.0   ;;  %vm537_vm0 = vmmov 0   ;;  %v471_v1 = vld [vmem:[#allocation2] sm:$0xff]   ;;  %vm72_vm1 = vcmask 130048   ;;  %v344_v43 = vlaneseq }
  0x1d   :  { %419 = vmatprep.subr.bf16.mxu0 %v536_v0  ;;  %421 = vmatprep.mubr.msk.bf16.mxu0 %vm537_vm0, %v536_v0  ;;  %v55_v2 = vld [vmem:[%s672_s0] sm:$0xff]  ;;  %v472_v4 = vld [vmem:[%s675_s3 + $0x38] sm:$0xff]   ;;  %v473_v5 = vld [vmem:[%s675_s3 + $0x30] sm:$0xff]   ;;  %vm342_vm2 = vcmask 31744   ;;  %vm366_vm5 = vcmask 7168  }
  0x1e   :  { %425 = vmatprep.subr.bf16.mxu1 %v536_v0  ;;  %441 = vmatprep.mubr.msk.bf16.mxu1 %vm537_vm0, %v536_v0  ;;  %v56_v3 = vpack.c.bf16 %v55_v2, %v55_v2  ;;  %v474_v6 = vld [vmem:[%s675_s3 + $0x28] sm:$0xff]   ;;  %v475_v7 = vld [vmem:[%s675_s3 + $0x20] sm:$0xff]   ;;  %v476_v8 = vld [vmem:[%s675_s3 + $0x18] sm:$0xff]   ;;  %v345_v44 = vand.u32 127, %v344_v43 }
  0x1f   :  { %420 = vmatpush3.bf16.msra.mxu0 %v471_v1  ;;  %426 = vmatpush3.bf16.msra.mxu1 %v472_v4  ;;  %v477_v9 = vld [vmem:[%s675_s3 + $0x10] sm:$0xff]   ;;  %v478_v10 = vld [vmem:[%s675_s3 + $0x8] sm:$0xff]   ;;  %v479_v11 = vld [vmem:[%s675_s3] sm:$0xff]  }
  0x20   :  { %445 = vmatprep.subr.bf16.mxu0 %v536_v0  ;;  %427 = vmatprep.subr.bf16.mxu1 %v536_v0  ;;  %v480_v12 = vld [vmem:[%s677_s5 + $0x38] sm:$0xff]   ;;  %v481_v13 = vld [vmem:[%s677_s5 + $0x30] sm:$0xff]   ;;  %v482_v14 = vld [vmem:[%s677_s5 + $0x28] sm:$0xff]  }
  0x21   :  { %v483_v15 = vld [vmem:[%s677_s5 + $0x20] sm:$0xff]   ;;  %v484_v16 = vld [vmem:[%s677_s5 + $0x18] sm:$0xff]   ;;  %v485_v17 = vld [vmem:[%s677_s5 + $0x10] sm:$0xff]  }
  0x22   :  { %422 = vmatmul.mubr.msk.bf16.vlgmr.msra.gmra.mxu0 %vm72_vm1, %v56_v3  ;;  %v378_v18 = vld [vmem:[%s674_s2] ss:$0 sm:$0xff]  ;;  %v486_v26 = vld [vmem:[%s677_s5 + $0x8] sm:$0xff]  }
  0x23   :  { %461 = vmatprep.mubr.msk.bf16.mxu0 %vm537_vm0, %v536_v0  ;;  %428 = vmatpush3.bf16.msra.mxu1 %v473_v5  ;;  %v487_v27 = vld [vmem:[%s677_s5] sm:$0xff]   ;;  %v390_v36 = vld [vmem:[#allocation4] ss:$0 sm:$0xff] }
  0x24   :  { %429 = vmatprep.subr.bf16.mxu1 %v536_v0  ;;  %446 = vmatpush3.bf16.msra.mxu0 %v480_v12  ;;  %v381_v28 = vld [vmem:[%s676_s4] ss:$0 sm:$0xff] }
  0x25   :  { %447 = vmatprep.subr.bf16.mxu0 %v536_v0 }
  0x27   :  { %430 = vmatpush3.bf16.msra.mxu1 %v474_v6 }
  0x28   :  { %431 = vmatprep.subr.bf16.mxu1 %v536_v0  ;;  %448 = vmatpush3.bf16.msra.mxu0 %v481_v13 }
  0x29   :  { %449 = vmatprep.subr.bf16.mxu0 %v536_v0 }
  0x2b   :  { %432 = vmatpush3.bf16.msra.mxu1 %v475_v7 }
  0x2c   :  { %433 = vmatprep.subr.bf16.mxu1 %v536_v0  ;;  %450 = vmatpush3.bf16.msra.mxu0 %v482_v14 }
  0x2d   :  { %451 = vmatprep.subr.bf16.mxu0 %v536_v0 }
  0x2f   :  { %434 = vmatpush3.bf16.msra.mxu1 %v476_v8 }
  0x30   :  { %435 = vmatprep.subr.bf16.mxu1 %v536_v0  ;;  %452 = vmatpush3.bf16.msra.mxu0 %v483_v15 }
  0x31   :  { %453 = vmatprep.subr.bf16.mxu0 %v536_v0 }
  0x33   :  { %436 = vmatpush3.bf16.msra.mxu1 %v477_v9 }
  0x34   :  { %437 = vmatprep.subr.bf16.mxu1 %v536_v0  ;;  %454 = vmatpush3.bf16.msra.mxu0 %v484_v16 }
  0x35   :  { %455 = vmatprep.subr.bf16.mxu0 %v536_v0 }
  0x37   :  { %438 = vmatpush3.bf16.msra.mxu1 %v478_v10 }
  0x38   :  { %439 = vmatprep.subr.bf16.mxu1 %v536_v0  ;;  %456 = vmatpush3.bf16.msra.mxu0 %v485_v17 }
  0x39   :  { %457 = vmatprep.subr.bf16.mxu0 %v536_v0 }
  0x3b   :  { %440 = vmatpush3.bf16.msra.mxu1 %v479_v11 }
  0x3c   :  { %458 = vmatpush3.bf16.msra.mxu0 %v486_v26 }
  0x3d   :  { %459 = vmatprep.subr.bf16.mxu0 %v536_v0 }
  0x40   :  { %460 = vmatpush3.bf16.msra.mxu0 %v487_v27 }
  0xe2   :  { %v110_v19 = vpop.f32.mrf.mxu0 }
  0xe3   :  { %v111_v20 = vadd.f32 %v378_v18, %v110_v19 }
  0xe4   :  { %v423_v21 = vpop.f32.mrf.mxu0 }
  0xe5   :  { %v116_v22 = vmax.f32 %v111_v20, 0.0 }
  0xe6   :  { %v113_v23 = vpop.f32.mrf.mxu0 }
  0xe7   :  { %v117_v24 = vpack.c.bf16 %v116_v22, %v116_v22 }
  0xe8   :  { %v424_v25 = vpop.f32.mrf.mxu0 }
  0xe9   :  { %442 = vmatmul.mubr.bf16.vlgmr.msra.gmra.mxu1 %v117_v24 }
 0x1a9   :  { %v223_v29 = vpop.f32.mrf.mxu1 }
 0x1aa   :  { %v224_v30 = vadd.f32 %v381_v28, %v223_v29 }
 0x1ab   :  { %v443_v31 = vpop.f32.mrf.mxu1 }
 0x1ac   :  { %v229_v32 = vmax.f32 %v224_v30, 0.0 }
 0x1ad   :  { %v226_v33 = vpop.f32.mrf.mxu1 }
 0x1ae   :  { %v230_v34 = vpack.c.bf16 %v229_v32, %v229_v32 }
 0x1af   :  { %v444_v35 = vpop.f32.mrf.mxu1 }
 0x1b0   :  { %462 = vmatmul.mubr.bf16.vlgmr.msra.gmra.mxu0 %v230_v34 }
 0x270   :  { %v336_v37 = vpop.f32.mrf.mxu0 }
 0x271   :  { %v337_v38 = vadd.f32 %v390_v36, %v336_v37 }
 0x272   :  { %v463_v39 = vpop.f32.mrf.mxu0 }
 0x273   :  { %v346_v40 = vsel %vm342_vm2, %v337_v38, -inf  ;;  %343 = vst.msk [vmem:[%s679_s7] sm:$0xff] %vm342_vm2, %v337_v38 }
 0x274   :  { %347 = vmax.xlane.f32.xlu0 %v346_v40  ;;  %v339_v41 = vpop.f32.mrf.mxu0 }
 0x276   :  { %v464_v42 = vpop.f32.mrf.mxu0 }
 0x2fd   :  { %v348_v45 = vpop.xlane.xlu0 %347 }
 0x2fe   :  { %vm349_vm3 = vcmp.eq.f32.partialorder %v337_v38, %v348_v45 }
 0x2ff   :  { %v350_v46 = vsel %vm349_vm3, %v345_v44, 4 }
 0x300   :  { %v351_v47 = vsel %vm342_vm2, %v350_v46, 2147483647 }
 0x301   :  { %v353_v48 = vshra.s32 %v351_v47, 16  ;;  %v352_v50 = vand.u32 65535, %v351_v47 }
 0x303   :  { %v355_v49 = vcvt.s32.f32 %v353_v48  ;;  %v354_v52 = vcvt.s32.f32 %v352_v50 }
 0x305   :  { %356 = vmin.xlane.f32.xlu0 %v355_v49 }
 0x38e   :  { %v357_v51 = vpop.xlane.xlu0 %356 }
 0x38f   :  { %vm358_vm4 = vcmp.eq.f32.partialorder %v355_v49, %v357_v51  ;;  %v363_v54 = vcvt.f32.s32 %v357_v51 }
 0x390   :  { %v359_v53 = vsel %vm358_vm4, %v354_v52, inf }
 0x391   :  { %360 = vmin.xlane.f32.xlu1 %v359_v53  ;;  %v364_v56 = vshll.u32 %v363_v54, 16 }
 0x41a   :  { %v361_v55 = vpop.xlane.xlu1 %360 }
 0x41b   :  { %v362_v57 = vcvt.f32.s32 %v361_v55 }
 0x41d   :  { %v365_v58 = vadd.s32 %v364_v56, %v362_v57 }
 0x41f   :  { %367 = vst.msk [vmem:[%s680_s8] sm:$0xff] %vm366_vm5, %v365_v58 }
 0x420   :  { %376 = vsyncpa [#allocation3], 1 }
 0x421   :  { %377 = vsyncpa [#allocation5], 1 }

</bundles_post_ra>
